<compile_context>
chip_gen: v7x
topology: tpu7x:2x2x1
jax: 0.10.0
libtpu: 0.0.40
codegen_flags: <defaults>
</compile_context>

<pallas_src>
import functools
import math

import numpy as np

import jax
import jax.numpy as jnp
from jax.experimental import pallas as pl
from jax.experimental.pallas import tpu as pltpu


# ---------------------------------------------------------------------------
# Kernel: one grid step = one batch sample.
# ---------------------------------------------------------------------------
def _upconv_kernel(x_ref, w_ref, b_ref, scale_ref, o_ref, *, C_in, C_out, W, S, eps):
    """x_ref:     (1, C_in, S)        flattened input sample (S = H*W on lanes)
       w_ref:     (4*C_out, 9*C_in)   effective per-phase weights (wrapper-built)
       b_ref:     (4*C_out, 1)        conv bias, tiled over the 4 phases
       scale_ref: (1, C_out, 1)       Dropout2d channel scale (0 or 1/(1-p), 1 in eval)
       o_ref:     (1, 4, C_out, S)    phase-major output (phase = 2a + b)
    """
    xf = x_ref[0]                                            # (C_in, S), lane-dense

    # Column-boundary masks for the +/-1 lane shifts (j = s % W).
    col = jax.lax.broadcasted_iota(jnp.int32, (1, S), 1)
    j = col % W
    mask_l = j != 0            # valid positions when reading column j-1
    mask_r = j != (W - 1)      # valid positions when reading column j+1

    def shifted(k):
        # y[:, s] = xf[:, s + k] with zero fill at the array ends (flat shift).
        if k == 0:
            return xf
        z = jnp.zeros((C_in, abs(k)), jnp.float32)
        if k > 0:
            return jnp.concatenate([xf[:, k:], z], axis=1)
        return jnp.concatenate([z, xf[:, :k]], axis=1)

    # im2col over the ORIGINAL HxW grid: 9 shifted copies (dr, dc in {-1,0,1}).
    # Flat shift by dr*W + dc + column mask == zero-padded 2D shift.
    parts = []
    for dr in (-1, 0, 1):
        for dc in (-1, 0, 1):
            p = shifted(dr * W + dc)
            if dc == -1:
                p = jnp.where(mask_l, p, 0.0)
            elif dc == 1:
                p = jnp.where(mask_r, p, 0.0)
            parts.append(p)
    patch = jnp.concatenate(parts, axis=0)                   # (9*C_in, S)

    # Single MXU matmul: all 4 phases at once (M = 4*C_out, K = 9*C_in, N = S).
    acc = jnp.dot(w_ref[...], patch,
                  preferred_element_type=jnp.float32)        # (4*C_out, S)
    acc = acc + b_ref[...]                                   # bias broadcast

    # InstanceNorm2d (affine=False, biased var, eps): per output channel over the
    # whole 2Hx2W plane == over (phase, S).  Leading-dim split reshape is free.
    y = acc.reshape(4, C_out, S)
    mean = jnp.mean(y, axis=(0, 2), keepdims=True)
    cen = y - mean
    var = jnp.mean(cen * cen, axis=(0, 2), keepdims=True)
    y = cen * jax.lax.rsqrt(var + eps)

    # ReLU + Dropout2d channel scaling.
    y = jnp.maximum(y, 0.0)
    y = y * scale_ref[0][None]                               # (1, C_out, 1) broadcast

    o_ref[0] = y.astype(o_ref.dtype)                         # unmasked 256-lane stores


# ---------------------------------------------------------------------------
# Wrapper-side weight folding: conv taps (kh, kw) -> per-phase shift taps (dr, dc).
# ---------------------------------------------------------------------------
def _phase_tap_matrix(transposed):
    """M[ph, t, kh, kw] = 1 where conv tap (kh, kw) contributes to shift tap
    t = (dr+1)*3 + (dc+1) for output phase ph = 2a + b (accumulated for nearest)."""
    def shift_of(parity, k):
        if not transposed:
            # nearest-neighbour x2 upsample + 3x3 conv (pad 1)
            if parity == 0:
                return -1 if k == 0 else 0
            return 0 if k < 2 else 1
        else:
            # stride-2 zero insertion (ConvTranspose2d s=2, p=1, output_padding=1)
            if parity == 0:
                return 0 if k == 1 else None
            return {0: 0, 2: 1}.get(k, None)

    M = np.zeros((4, 9, 3, 3), np.float32)
    for a in (0, 1):
        for b in (0, 1):
            for kh in range(3):
                dr = shift_of(a, kh)
                if dr is None:
                    continue
                for kw in range(3):
                    dc = shift_of(b, kw)
                    if dc is None:
                        continue
                    M[a * 2 + b, (dr + 1) * 3 + (dc + 1), kh, kw] += 1.0
    return M


def upconv_block_dropout(x_nchw, params, *, up_conv, p=0.2, train=False, seed=0):
    """UpConvBlockDropout.forward as a fused Pallas TPU kernel (NCHW in / out)."""
    w, b = params
    N, C_in, H, W = x_nchw.shape
    S = H * W

    if up_conv:
        # ConvTranspose2d weight (C_in, C_out, 3, 3) -> equivalent conv weight.
        C_out = w.shape[1]
        wconv = jnp.transpose(w[:, :, ::-1, ::-1], (1, 0, 2, 3))
    else:
        # Conv2d weight (C_out, C_in, 3, 3)
        C_out = w.shape[0]
        wconv = w
    wconv = wconv.astype(jnp.float32)

    # Effective per-phase weights: rows = ph*C_out + o, cols = t*C_in + c.
    M = jnp.asarray(_phase_tap_matrix(bool(up_conv)), jnp.float32)
    w_eff = jnp.einsum("ptij,ocij->potc", M, wconv).reshape(4 * C_out, 9 * C_in)
    b4 = jnp.tile(b.astype(jnp.float32).reshape(1, C_out), (4, 1)).reshape(4 * C_out, 1)

    # Free, layout-preserving reshape: NCHW -> (N, C_in, H*W).  No transpose.
    xf = x_nchw.reshape(N, C_in, S).astype(jnp.float32)

    # Dropout2d channel scales (wrapper-side RNG: portable to interpret mode).
    if train and p > 0.0:
        keep = jax.random.bernoulli(jax.random.PRNGKey(seed), 1.0 - p, (N, C_out))
        scale = jnp.where(keep, 1.0 / (1.0 - p), 0.0).astype(jnp.float32)
    else:
        scale = jnp.ones((N, C_out), jnp.float32)
    scale = scale.reshape(N, C_out, 1)

    kernel = functools.partial(_upconv_kernel, C_in=C_in, C_out=C_out,
                               W=W, S=S, eps=1e-5)

    out = pl.pallas_call(
        kernel,
        out_shape=jax.ShapeDtypeStruct((N, 4, C_out, S), jnp.float32),
        grid_spec=pltpu.PrefetchScalarGridSpec(
            num_scalar_prefetch=0,
            grid=(N,),
            in_specs=[
                pl.BlockSpec((1, C_in, S), lambda n: (n, 0, 0)),
                pl.BlockSpec((4 * C_out, 9 * C_in), lambda n: (0, 0)),
                pl.BlockSpec((4 * C_out, 1), lambda n: (0, 0)),
                pl.BlockSpec((1, C_out, 1), lambda n: (n, 0, 0)),
            ],
            out_specs=pl.BlockSpec((1, 4, C_out, S), lambda n: (n, 0, 0, 0)),
        ),
        compiler_params=pltpu.CompilerParams(
            dimension_semantics=("parallel",)),
    )(xf, w_eff, b4, scale)

    # Phase de-interleave: (n, 2a+b, o, i*W+j) -> (n, o, 2i+a, 2j+b).
    out = out.reshape(N, 2, 2, C_out, H, W)
    out = jnp.transpose(out, (0, 3, 4, 1, 5, 2))
    return out.reshape(N, C_out, 2 * H, 2 * W)


# ---------------------------------------------------------------------------
# Pure-JAX reference (eval mode, no dropout) for the correctness check.
# ---------------------------------------------------------------------------
def _reference(x, w, b, *, up_conv, eps=1e-5):
    if up_conv:
        # ConvTranspose2d(k=3, s=2, p=1, output_padding=1) via lhs-dilated conv.
        w_flip = jnp.transpose(w[:, :, ::-1, ::-1], (1, 0, 2, 3))   # (C_out, C_in, 3, 3)
        out = jax.lax.conv_general_dilated(
            x, w_flip, window_strides=(1, 1), padding=((1, 2), (1, 2)),
            lhs_dilation=(2, 2), dimension_numbers=("NCHW", "OIHW", "NCHW"))
    else:
        xu = jnp.repeat(jnp.repeat(x, 2, axis=2), 2, axis=3)
        out = jax.lax.conv_general_dilated(
            xu, w, window_strides=(1, 1), padding=((1, 1), (1, 1)),
            dimension_numbers=("NCHW", "OIHW", "NCHW"))
    out = out + b[None, :, None, None]
    mean = jnp.mean(out, axis=(2, 3), keepdims=True)
    var = jnp.mean((out - mean) ** 2, axis=(2, 3), keepdims=True)
    out = (out - mean) * jax.lax.rsqrt(var + eps)
    return jnp.maximum(out, 0.0)


if __name__ == "__main__":
    key = jax.random.PRNGKey(0)
    k_x, k_w1, k_b1, k_w2, k_b2 = jax.random.split(key, 5)

    N, ch_in, ch_out, H, W = 2, 4, 8, 16, 16
    p = 0.2
    x = jax.random.normal(k_x, (N, ch_in, H, W), dtype=jnp.float32)
    bound = 1.0 / math.sqrt(ch_in * 9)

    # ---- up_conv=False: Upsample -> Conv2d -> IN -> ReLU -> Dropout2d (eval) ----
    w_c = jax.random.uniform(k_w1, (ch_out, ch_in, 3, 3), jnp.float32, -bound, bound)
    b_c = jax.random.uniform(k_b1, (ch_out,), jnp.float32, -bound, bound)

    y = jax.block_until_ready(
        upconv_block_dropout(x, (w_c, b_c), up_conv=False, p=p, train=False))
    y_ref = jax.block_until_ready(_reference(x, w_c, b_c, up_conv=False))
    assert y.shape == (N, ch_out, 2 * H, 2 * W)
    err = float(jnp.max(jnp.abs(y - y_ref)))
    assert err < 5e-4, err

    # ---- training mode: each (n, c) channel is either all-zero (dropped) or equal
    #      to the eval output scaled by 1/(1-p) (kept). ----
    y_tr = jax.block_until_ready(
        upconv_block_dropout(x, (w_c, b_c), up_conv=False, p=p, train=True, seed=123))
    kept = (jnp.max(jnp.abs(y_tr), axis=(2, 3)) > 0.0)[:, :, None, None]
    err_keep = float(jnp.max(jnp.abs(jnp.where(kept, y_tr - y_ref / (1.0 - p), 0.0))))
    assert err_keep < 5e-3, err_keep
    err_drop = float(jnp.max(jnp.abs(jnp.where(kept, 0.0, y_tr))))
    assert err_drop == 0.0, err_drop

    # ---- up_conv=True: ConvTranspose2d -> IN -> ReLU -> Dropout2d (eval) ----
    w_t = jax.random.uniform(k_w2, (ch_in, ch_out, 3, 3), jnp.float32, -bound, bound)
    b_t = jax.random.uniform(k_b2, (ch_out,), jnp.float32, -bound, bound)

    y2 = jax.block_until_ready(
        upconv_block_dropout(x, (w_t, b_t), up_conv=True, p=p, train=False))
    y2_ref = jax.block_until_ready(_reference(x, w_t, b_t, up_conv=True))
    assert y2.shape == (N, ch_out, 2 * H, 2 * W)
    err2 = float(jnp.max(jnp.abs(y2 - y2_ref)))
    assert err2 < 5e-4, err2

    print("KERNEL_OK")
</pallas_src>

<mosaic_0001>
module attributes {stable_mosaic.version = 11 : i64} {
  func.func @_upconv_kernel(%arg0: i32, %arg1: memref<1x4x256xf32, #tpu.memory_space<vmem>>, %arg2: memref<32x36xf32, #tpu.memory_space<vmem>>, %arg3: memref<32x1xf32, #tpu.memory_space<vmem>>, %arg4: memref<1x8x1xf32, #tpu.memory_space<vmem>>, %arg5: memref<1x4x8x256xf32, #tpu.memory_space<vmem>>) attributes {dimension_semantics = [#tpu.dimension_semantics<parallel>], iteration_bounds = array<i64: 2>, scalar_prefetch = 0 : i64, scratch_operands = 0 : i64, tpu.core_type = #tpu.core_type<tc>, window_params = [{transform_indices = @transform_0, window_bounds = array<i64: 1, 4, 256>}, {pipeline_mode = #tpu.pipeline_mode<synchronous>, transform_indices = @transform_1, window_bounds = array<i64: 32, 36>}, {pipeline_mode = #tpu.pipeline_mode<synchronous>, transform_indices = @transform_2, window_bounds = array<i64: 32, 1>}, {transform_indices = @transform_3, window_bounds = array<i64: 1, 8, 1>}, {transform_indices = @transform_4, window_bounds = array<i64: 1, 4, 8, 256>}]} {
    %c0 = arith.constant 0 : index
    %c0_0 = arith.constant 0 : index
    %c0_1 = arith.constant 0 : index
    %0 = vector.load %arg1[%c0, %c0_0, %c0_1] : memref<1x4x256xf32, #tpu.memory_space<vmem>>, vector<1x4x256xf32>
    %1 = vector.shape_cast %0 : vector<1x4x256xf32> to vector<4x256xf32>
    %2 = tpu.iota {dimensions = array<i32: 1>} : vector<1x256xi32>
    %c16_i32 = arith.constant 16 : i32
    %c0_i32 = arith.constant 0 : i32
    %3 = arith.cmpi eq, %c16_i32, %c0_i32 : i32
    %c1_i32 = arith.constant 1 : i32
    %4 = arith.select %3, %c1_i32, %c16_i32 : i32
    %5 = vector.broadcast %4 : i32 to vector<1x256xi32>
    %6 = arith.remsi %2, %5 : vector<1x256xi32>
    %c0_i32_2 = arith.constant 0 : i32
    %7 = vector.broadcast %c0_i32_2 : i32 to vector<1x256xi32>
    %8 = arith.cmpi ne, %6, %7 : vector<1x256xi32>
    %c0_i32_3 = arith.constant 0 : i32
    %9 = vector.broadcast %c0_i32_3 : i32 to vector<1x256xi32>
    %10 = arith.cmpi slt, %6, %9 : vector<1x256xi32>
    %c0_i32_4 = arith.constant 0 : i32
    %11 = arith.cmpi slt, %4, %c0_i32_4 : i32
    %12 = vector.broadcast %11 : i1 to vector<1x256xi1>
    %13 = vector.broadcast %12 : vector<1x256xi1> to vector<1x256xi1>
    %14 = arith.xori %10, %13 : vector<1x256xi1>
    %15 = arith.andi %14, %8 : vector<1x256xi1>
    %16 = vector.broadcast %4 : i32 to vector<1x256xi32>
    %17 = arith.addi %6, %16 : vector<1x256xi32>
    %18 = arith.select %15, %17, %6 : vector<1x256xi1>, vector<1x256xi32>
    %c0_i32_5 = arith.constant 0 : i32
    %19 = vector.broadcast %c0_i32_5 : i32 to vector<1x256xi32>
    %20 = arith.cmpi ne, %18, %19 : vector<1x256xi32>
    %c15_i32 = arith.constant 15 : i32
    %21 = vector.broadcast %c15_i32 : i32 to vector<1x256xi32>
    %22 = arith.cmpi ne, %18, %21 : vector<1x256xi32>
    %cst = arith.constant 0.000000e+00 : f32
    %23 = vector.broadcast %cst : f32 to vector<4x17xf32>
    %24 = vector.extract_strided_slice %1 {offsets = [0, 0], sizes = [4, 239], strides = [1, 1]} : vector<4x256xf32> to vector<4x239xf32>
    %25 = tpu.concatenate %23, %24 in 1 : vector<4x17xf32>, vector<4x239xf32> -> vector<4x256xf32>
    %cst_6 = arith.constant 0.000000e+00 : f32
    %26 = vector.shape_cast %20 : vector<1x256xi1> to vector<1x256xi1>
    %27 = vector.broadcast %26 : vector<1x256xi1> to vector<4x256xi1>
    %28 = vector.broadcast %cst_6 : f32 to vector<4x256xf32>
    %29 = arith.select %27, %25, %28 : vector<4x256xi1>, vector<4x256xf32>
    %cst_7 = arith.constant 0.000000e+00 : f32
    %30 = vector.broadcast %cst_7 : f32 to vector<4x16xf32>
    %31 = vector.extract_strided_slice %1 {offsets = [0, 0], sizes = [4, 240], strides = [1, 1]} : vector<4x256xf32> to vector<4x240xf32>
    %32 = tpu.concatenate %30, %31 in 1 : vector<4x16xf32>, vector<4x240xf32> -> vector<4x256xf32>
    %cst_8 = arith.constant 0.000000e+00 : f32
    %33 = vector.broadcast %cst_8 : f32 to vector<4x15xf32>
    %34 = vector.extract_strided_slice %1 {offsets = [0, 0], sizes = [4, 241], strides = [1, 1]} : vector<4x256xf32> to vector<4x241xf32>
    %35 = tpu.concatenate %33, %34 in 1 : vector<4x15xf32>, vector<4x241xf32> -> vector<4x256xf32>
    %cst_9 = arith.constant 0.000000e+00 : f32
    %36 = vector.shape_cast %22 : vector<1x256xi1> to vector<1x256xi1>
    %37 = vector.broadcast %36 : vector<1x256xi1> to vector<4x256xi1>
    %38 = vector.broadcast %cst_9 : f32 to vector<4x256xf32>
    %39 = arith.select %37, %35, %38 : vector<4x256xi1>, vector<4x256xf32>
    %cst_10 = arith.constant 0.000000e+00 : f32
    %40 = vector.broadcast %cst_10 : f32 to vector<4x1xf32>
    %41 = vector.extract_strided_slice %1 {offsets = [0, 0], sizes = [4, 255], strides = [1, 1]} : vector<4x256xf32> to vector<4x255xf32>
    %42 = tpu.concatenate %40, %41 in 1 : vector<4x1xf32>, vector<4x255xf32> -> vector<4x256xf32>
    %cst_11 = arith.constant 0.000000e+00 : f32
    %43 = vector.shape_cast %20 : vector<1x256xi1> to vector<1x256xi1>
    %44 = vector.broadcast %43 : vector<1x256xi1> to vector<4x256xi1>
    %45 = vector.broadcast %cst_11 : f32 to vector<4x256xf32>
    %46 = arith.select %44, %42, %45 : vector<4x256xi1>, vector<4x256xf32>
    %cst_12 = arith.constant 0.000000e+00 : f32
    %47 = vector.broadcast %cst_12 : f32 to vector<4x1xf32>
    %48 = vector.extract_strided_slice %1 {offsets = [0, 1], sizes = [4, 255], strides = [1, 1]} : vector<4x256xf32> to vector<4x255xf32>
    %49 = tpu.concatenate %48, %47 in 1 : vector<4x255xf32>, vector<4x1xf32> -> vector<4x256xf32>
    %cst_13 = arith.constant 0.000000e+00 : f32
    %50 = vector.shape_cast %22 : vector<1x256xi1> to vector<1x256xi1>
    %51 = vector.broadcast %50 : vector<1x256xi1> to vector<4x256xi1>
    %52 = vector.broadcast %cst_13 : f32 to vector<4x256xf32>
    %53 = arith.select %51, %49, %52 : vector<4x256xi1>, vector<4x256xf32>
    %cst_14 = arith.constant 0.000000e+00 : f32
    %54 = vector.broadcast %cst_14 : f32 to vector<4x15xf32>
    %55 = vector.extract_strided_slice %1 {offsets = [0, 15], sizes = [4, 241], strides = [1, 1]} : vector<4x256xf32> to vector<4x241xf32>
    %56 = tpu.concatenate %55, %54 in 1 : vector<4x241xf32>, vector<4x15xf32> -> vector<4x256xf32>
    %cst_15 = arith.constant 0.000000e+00 : f32
    %57 = vector.shape_cast %20 : vector<1x256xi1> to vector<1x256xi1>
    %58 = vector.broadcast %57 : vector<1x256xi1> to vector<4x256xi1>
    %59 = vector.broadcast %cst_15 : f32 to vector<4x256xf32>
    %60 = arith.select %58, %56, %59 : vector<4x256xi1>, vector<4x256xf32>
    %cst_16 = arith.constant 0.000000e+00 : f32
    %61 = vector.broadcast %cst_16 : f32 to vector<4x16xf32>
    %62 = vector.extract_strided_slice %1 {offsets = [0, 16], sizes = [4, 240], strides = [1, 1]} : vector<4x256xf32> to vector<4x240xf32>
    %63 = tpu.concatenate %62, %61 in 1 : vector<4x240xf32>, vector<4x16xf32> -> vector<4x256xf32>
    %cst_17 = arith.constant 0.000000e+00 : f32
    %64 = vector.broadcast %cst_17 : f32 to vector<4x17xf32>
    %65 = vector.extract_strided_slice %1 {offsets = [0, 17], sizes = [4, 239], strides = [1, 1]} : vector<4x256xf32> to vector<4x239xf32>
    %66 = tpu.concatenate %65, %64 in 1 : vector<4x239xf32>, vector<4x17xf32> -> vector<4x256xf32>
    %cst_18 = arith.constant 0.000000e+00 : f32
    %67 = vector.shape_cast %22 : vector<1x256xi1> to vector<1x256xi1>
    %68 = vector.broadcast %67 : vector<1x256xi1> to vector<4x256xi1>
    %69 = vector.broadcast %cst_18 : f32 to vector<4x256xf32>
    %70 = arith.select %68, %66, %69 : vector<4x256xi1>, vector<4x256xf32>
    %71 = tpu.concatenate %29, %32, %39, %46, %1, %53, %60, %63, %70 in 0 : vector<4x256xf32>, vector<4x256xf32>, vector<4x256xf32>, vector<4x256xf32>, vector<4x256xf32>, vector<4x256xf32>, vector<4x256xf32>, vector<4x256xf32>, vector<4x256xf32> -> vector<36x256xf32>
    %c0_19 = arith.constant 0 : index
    %c0_20 = arith.constant 0 : index
    %72 = vector.load %arg2[%c0_19, %c0_20] : memref<32x36xf32, #tpu.memory_space<vmem>>, vector<32x36xf32>
    %cst_21 = arith.constant dense<0.000000e+00> : vector<32x256xf32>
    %73 = tpu.matmul %72, %71, %cst_21 {dimension_numbers = #tpu.dot_dimension_numbers<[1], [0], [0], [1], [0, 0, 1, 1], [], []>} : vector<32x36xf32>, vector<36x256xf32>, vector<32x256xf32> -> vector<32x256xf32>
    %c0_22 = arith.constant 0 : index
    %c0_23 = arith.constant 0 : index
    %74 = vector.load %arg3[%c0_22, %c0_23] : memref<32x1xf32, #tpu.memory_space<vmem>>, vector<32x1xf32>
    %75 = vector.broadcast %74 : vector<32x1xf32> to vector<32x256xf32>
    %76 = arith.addf %73, %75 : vector<32x256xf32>
    %77 = vector.shape_cast %76 : vector<32x256xf32> to vector<4x8x256xf32>
    %cst_24 = arith.constant dense<0.000000e+00> : vector<8xf32>
    %78 = vector.multi_reduction <add>, %77, %cst_24 [0, 2] : vector<4x8x256xf32> to vector<8xf32>
    %79 = vector.shape_cast %78 : vector<8xf32> to vector<1x8x1xf32>
    %cst_25 = arith.constant 1.024000e+03 : f32
    %80 = vector.broadcast %cst_25 : f32 to vector<1x8x1xf32>
    %81 = arith.divf %79, %80 : vector<1x8x1xf32>
    %82 = vector.broadcast %81 : vector<1x8x1xf32> to vector<4x8x256xf32>
    %83 = arith.subf %77, %82 : vector<4x8x256xf32>
    %84 = arith.mulf %83, %83 : vector<4x8x256xf32>
    %cst_26 = arith.constant dense<0.000000e+00> : vector<8xf32>
    %85 = vector.multi_reduction <add>, %84, %cst_26 [0, 2] : vector<4x8x256xf32> to vector<8xf32>
    %86 = vector.shape_cast %85 : vector<8xf32> to vector<1x8x1xf32>
    %cst_27 = arith.constant 1.024000e+03 : f32
    %87 = vector.broadcast %cst_27 : f32 to vector<1x8x1xf32>
    %88 = arith.divf %86, %87 : vector<1x8x1xf32>
    %cst_28 = arith.constant 9.99999974E-6 : f32
    %89 = vector.broadcast %cst_28 : f32 to vector<1x8x1xf32>
    %90 = arith.addf %88, %89 : vector<1x8x1xf32>
    %91 = math.rsqrt %90 : vector<1x8x1xf32>
    %92 = vector.broadcast %91 : vector<1x8x1xf32> to vector<4x8x256xf32>
    %93 = arith.mulf %83, %92 : vector<4x8x256xf32>
    %cst_29 = arith.constant 0.000000e+00 : f32
    %94 = vector.broadcast %cst_29 : f32 to vector<4x8x256xf32>
    %95 = arith.maximumf %93, %94 : vector<4x8x256xf32>
    %c0_30 = arith.constant 0 : index
    %c0_31 = arith.constant 0 : index
    %c0_32 = arith.constant 0 : index
    %96 = vector.load %arg4[%c0_30, %c0_31, %c0_32] : memref<1x8x1xf32, #tpu.memory_space<vmem>>, vector<1x8x1xf32>
    %97 = vector.shape_cast %96 : vector<1x8x1xf32> to vector<8x1xf32>
    %98 = vector.shape_cast %97 : vector<8x1xf32> to vector<1x8x1xf32>
    %99 = vector.broadcast %98 : vector<1x8x1xf32> to vector<4x8x256xf32>
    %100 = arith.mulf %95, %99 : vector<4x8x256xf32>
    %c0_33 = arith.constant 0 : index
    %c0_34 = arith.constant 0 : index
    %c0_35 = arith.constant 0 : index
    %c0_36 = arith.constant 0 : index
    %101 = vector.load %arg5[%c0_33, %c0_34, %c0_35, %c0_36] : memref<1x4x8x256xf32, #tpu.memory_space<vmem>>, vector<1x4x8x256xf32>
    %102 = vector.shape_cast %101 : vector<1x4x8x256xf32> to vector<4x8x256xf32>
    %103 = vector.shape_cast %100 : vector<4x8x256xf32> to vector<1x4x8x256xf32>
    tpu.vector_store %arg5[%c0_33, %c0_34, %c0_35, %c0_36], %103 {strides = array<i32>} : memref<1x4x8x256xf32, #tpu.memory_space<vmem>>, vector<1x4x8x256xf32>,
    return
  }
  func.func @transform_0(%arg0: i32) -> (i32, i32, i32) {
    %c0_i32 = arith.constant 0 : i32
    %c0_i32_0 = arith.constant 0 : i32
    %c0_i32_1 = arith.constant 0 : i32
    return %arg0, %c0_i32, %c0_i32_0 : i32, i32, i32
  }
  func.func @transform_1(%arg0: i32) -> (i32, i32) {
    %c0_i32 = arith.constant 0 : i32
    %c0_i32_0 = arith.constant 0 : i32
    %c0_i32_1 = arith.constant 0 : i32
    return %c0_i32, %c0_i32_0 : i32, i32
  }
  func.func @transform_2(%arg0: i32) -> (i32, i32) {
    %c0_i32 = arith.constant 0 : i32
    %c0_i32_0 = arith.constant 0 : i32
    %c0_i32_1 = arith.constant 0 : i32
    return %c0_i32, %c0_i32_0 : i32, i32
  }
  func.func @transform_3(%arg0: i32) -> (i32, i32, i32) {
    %c0_i32 = arith.constant 0 : i32
    %c0_i32_0 = arith.constant 0 : i32
    %c0_i32_1 = arith.constant 0 : i32
    return %arg0, %c0_i32, %c0_i32_0 : i32, i32, i32
  }
  func.func @transform_4(%arg0: i32) -> (i32, i32, i32, i32) {
    %c0_i32 = arith.constant 0 : i32
    %c0_i32_0 = arith.constant 0 : i32
    %c0_i32_1 = arith.constant 0 : i32
    %c0_i32_2 = arith.constant 0 : i32
    return %arg0, %c0_i32, %c0_i32_0, %c0_i32_1 : i32, i32, i32, i32
  }
}

</mosaic_0001>

<bundles_post_ra>
// kernel: tpu_custom_call.1
= control target key start
LH: loop header
LB: loop body
LE: loop exit
PB: predicated region body
PF: predicated region fallthrough
CT: control target
= control target key end

     0   :  { %9 = vsyncpa [#allocation3], 0  ;;  %s1123_s0 = inlined_call_operand.vmem [shape: f32[2,4,256], index: 0, kind: input, shape index: {}]   ;;  %s1124_s1 = inlined_call_operand.vmem [shape: f32[32,36], index: 1, kind: input, shape index: {}]   ;;  %s1125_s2 = inlined_call_operand.vmem [shape: f32[32,1], index: 2, kind: input, shape index: {}]   ;;  %s1126_s3 = inlined_call_operand.vmem [shape: f32[2,8,1], index: 3, kind: input, shape index: {}]   ;;  %s1127_s4 = inlined_call_operand.hbm [shape: f32[2,4,8,256], index: 4, kind: output, shape index: {}]  }
   0x1   :  { %11 = vsyncpa [#allocation3 + $0x1], 0  ;;  %s896_s15 = smov 0   ;;  %s898_s16 = smov 0  }
   0x2   :  { %s900_s17 = smov 0   ;;  %s902_s18 = smov 0  }
   0x3 LB: > { %s917_s19 = sadd.s32 4294967295, %s857_s18   ;;  %s670_s20 = sadd.s32 4294967294, %s857_s18   ;;  %s857_s18 = sphi %s902_s18, %s1141_s18   ;;  %s853_s17 = sphi %s900_s17, %s1140_s17   ;;  %s849_s16 = sphi %s898_s16, %s1139_s16   ;;  %s845_s15 = sphi %s896_s15, %s1138_s15  }
   0x4   : > { %s921_s21 = sadd.s32 1, %s857_s18   ;;  %s118_s22 = sadd.s32 1, %s853_s17 }
   0x5   : > { %s115_s23 = ssub.s32 %s857_s18, %s921_s21  ;;  %p128_p0 = scmp.ne.s32.totalorder %s853_s17, %s849_s16 }
   0x6   : > { %p116_p1 = scmp.eq.s32.totalorder %s115_s23, 0  ;;  %p129_p2 = scmp.eq.s32.totalorder %s917_s19, 1 }
   0x7   : > { %p134_p3 = scmp.ne.s32.totalorder %s849_s16, %s845_s15  ;;  %p135_p4 = scmp.eq.s32.totalorder %s670_s20, 1 }
   0x8   : > { %s932_s24 = scalar_select %p116_p1, %s853_s17, %s118_s22  }
   0x9   : > { %p934_p5 = por %p129_p2, %p128_p0  ;;  %p938_p6 = por %p135_p4, %p134_p3 }
   0xa   : > { %p673_p7 = scmp.ge.s32.totalorder %s857_s18, 1  ;;  %p174_p8 = scmp.lt.s32.totalorder %s857_s18, 3 }
   0xc   : > { %p175_p9 = pnand %p673_p7, %p174_p8 }
   0xd   : > { %p204_p10 = scmp.lt.s32.totalorder (!%p175_p9), %s917_s19, 1  ;;  %s859_s6 = smov (!%p175_p9), 17   ;;  %v867_v4 = vmov (!%p175_p9), 0.0   ;;  %v373_v5 = vld [vmem:[%s1125_s2] sm:$0xff] (!%p175_p9)  ;;  %v868_v6 = vmov (!%p175_p9), 0   ;;  %v374_v7 = vld [vmem:[%s1125_s2 + $0x8] sm:$0xff] (!%p175_p9)  ;;  %v214_v10 = vlaneseq (!%p175_p9) }
   0xe   : > { %178 = sbr.rel (%p175_p9) target bundleno = 743 (0x2e7), region = 36  ;;  %s860_s7 = smov (!%p175_p9), 1   ;;  %480 = vmatprep.mubr.f32.mxu0 (!%p175_p9), %v867_v4  ;;  %492 = vmatprep.mubr.f32.mxu1 (!%p175_p9), %v867_v4  ;;  %v375_v8 = vld [vmem:[%s1125_s2 + $0x10] sm:$0xff] (!%p175_p9)  ;;  %v376_v9 = vld [vmem:[%s1125_s2 + $0x18] sm:$0xff] (!%p175_p9)  ;;  %vm251_vm0 = vcmask (!%p175_p9), 138240   ;;  %vm289_vm2 = vcmask (!%p175_p9), 7168  }
   0xf   : > { %s861_s8 = smov (!%p175_p9), 15   ;;  %s862_s9 = smov (!%p175_p9), 16   ;;  %790 = vset.pattern.permute.xlu1 (!%p175_p9), %v868_v6  ;;  %791 = vset.pattern.permute.xlu0 (!%p175_p9), %v868_v6  ;;  %v215_v11 = vand.u32 (!%p175_p9), 127, %v214_v10  ;;  %vm274_vm4 = vcmask (!%p175_p9), 121856   ;;  %vm266_vm5 = vcmask (!%p175_p9), 130048   ;;  %vm300_vm6 = vcmask (!%p175_p9), 1039360  }
  0x10   : > { %s863_s10 = smov (!%p175_p9), 127   ;;  %s864_s11 = smov (!%p175_p9), 112   ;;  %vm360_vm7 = vcmask (!%p175_p9), 1043456   ;;  %vm322_vm10 = vcmask (!%p175_p9), 916480   ;;  %vm311_vm11 = vcmask (!%p175_p9), 924672   ;;  %vm330_vm12 = vcmask (!%p175_p9), 908288  }
  0x11   : > { %s865_s12 = smov (!%p175_p9), 113   ;;  %s866_s13 = smov (!%p175_p9), 111   ;;  %v216_v12 = vadd.s32 (!%p175_p9), 128, %v215_v11  ;;  %v221_v13 = vand.u32 (!%p175_p9), 15, %v215_v11  ;;  %vm397_vm13 = vcmask (!%p175_p9), 293888   ;;  %v371_v16 = vld [vmem:[%s1124_s1 + $0x10] sm:$0xff] (!%p175_p9) }
  0x12   : > { %v372_v30 = vld [vmem:[%s1124_s1 + $0x18] sm:$0xff] (!%p175_p9)  ;;  %s690_s30 = sshll.u32 (!%p175_p9), %s917_s19, 10 }
  0x13   : > { %v228_v14 = vand.u32 (!%p175_p9), 15, %v216_v12  ;;  %vm981_vm1 = vcmp.ne.s32.totalorder (!%p175_p9), %v221_v13, 0  ;;  %vm999_vm9 = vcmp.ne.s32.totalorder (!%p175_p9), %v221_v13, 15 }
  0x15   : > { %s946_s27 = scalar_select %p204_p10, %s917_s19, 1  ;;  %vm985_vm3 = vcmp.ne.s32.totalorder %v228_v14, 0  ;;  %vm993_vm8 = vcmp.ne.s32.totalorder %v228_v14, 15 }
  0x16   : > { %s1075_s19 = scalar_lea.hbm %s1127_s4, %s690_s30 }
  0x17   : > { %s689_s28 = sshll.u32 %s946_s27, 3  ;;  %s201_s27 = sand.u32 1, %s849_s16  }
  0x18   : > { %s208_s5 = scalar_lea.vmem %s1123_s0, %s689_s28  ;;  %s212_s29 = scalar_lea.vmem %s1126_s3, %s689_s28 }
  0x19   : > { %v954_v0 = vld [vmem:[%s208_s5] sm:$0xff]  ;;  %s674_s28 = sshll.u32 %s201_s27, 6 }
  0x1a   : > { %v958_v1 = vcombine.high %v954_v0, %v954_v0  ;;  %s203_s5 = scalar_lea.vmem [#allocation2], %s674_s28 }
  0x1c   : > { %v765_v2 = vpack.i.bf16 %v958_v1, %v954_v0  ;;  %v775_v3 = vpack.i.bf16 %v954_v0, %v958_v1 }
  0x1e   : > { %766 = vrot.lane.b32.xlu1 %v765_v2, %s859_s6  ;;  %756 = vrot.lane.b32.xlu0 %v765_v2, %s860_s7  ;;  %s596_s6 = sshll.u32 %s203_s5, 4  ;;  %s1077_s6 = int_to_ptr.vmem [resolvable:$true] %s596_s6 }
  0x22   : > { %771 = vrot.lane.b32.xlu1 %v765_v2, %s861_s8  ;;  %761 = vrot.lane.b32.xlu0 %v765_v2, %s862_s9 }
  0x26   : > { %776 = vrot.lane.b32.xlu0 %v775_v3, %s863_s10  ;;  %781 = vrot.lane.b32.xlu1 %v775_v3, %s864_s11  ;;  %s1081_s10 = scalar_lea.sflag [#allocation3], %s201_s27  ;;  %s795_s11 = scalar_lea.vmem %s1077_s6, 1024 }
  0x27   : > { %p796_p11 = scmp.ne.s32.totalorder %s1077_s6, %s795_s11 }
  0x29   : > { %p797_p12 = pnand %p796_p11, %p934_p5 }
  0x2a   : > { %786 = vrot.lane.b32.xlu0 %v775_v3, %s865_s12  ;;  %328 = vrot.lane.b32.xlu1 %v958_v1, %s866_s13  ;;  %s869_s12 = smov [#allocation2]  }
  0x2b   : > { %p798_p13 = pneg %p797_p12 }
  0x2e   : > { %326 = vrot.lane.b32.xlu0 %v954_v0, %s866_s13  ;;  %379 = vperm.xlu1 %790, %v373_v5   ;;  %s799_s13 = sshll.u32 %s869_s12, 4  ;;  %s800_s13 = int_to_ptr.vmem [resolvable:$false] %s799_s13 }
  0x2f   : > { %s801_s14 = scalar_lea.vmem %s800_s13, 2048  ;;  %p802_p0 = scmp.lt.s32.totalorder %s1077_s6, %s800_s13 }
  0x30   : > { %p803_p1 = scmp.lt.s32.totalorder %s801_s14, %s795_s11 }
  0x32   : > { %384 = vperm.xlu0 %791, %v374_v7   ;;  %389 = vperm.xlu1 %790, %v375_v8   ;;  %p804_p2 = por %p803_p1, %p802_p0 }
  0x34   : > { %p805_p3 = pnand %p804_p2, %p798_p13 }
  0x36   : > { %394 = vperm.xlu1 %790, %v376_v9  }
  0x90   : > { %v767_v15 = vpop.permute.xlu1 %766  ;;  %v757_v17 = vpop.permute.xlu0 %756 }
  0x91   : > { %v769_v19 = vunpack.i.h.bf16 %v767_v15  ;;  %v768_v20 = vunpack.i.l.bf16 %v767_v15  ;;  %v759_v21 = vunpack.i.h.bf16 %v757_v17  ;;  %v758_v22 = vunpack.i.l.bf16 %v757_v17 }
  0x93   : > { %v255_v23 = vsel %vm251_vm0, 0.0, %v768_v20  ;;  %v290_v24 = vsel %vm289_vm2, %v758_v22, %v759_v21  ;;  %v293_v25 = vsel %vm289_vm2, 0.0, %v758_v22  ;;  %v252_v26 = vsel %vm251_vm0, %v768_v20, %v769_v19 }
  0x94   : > { %v294_v27 = vsel %vm981_vm1, %v293_v25, 0.0  ;;  %v772_v28 = vpop.permute.xlu1 %771  ;;  %v762_v29 = vpop.permute.xlu0 %761  ;;  %v295_v31 = vsel %vm985_vm3, %v290_v24, 0.0  ;;  %v261_v37 = vsel %vm985_vm3, %v252_v26, 0.0  ;;  %v260_v38 = vsel %vm981_vm1, %v255_v23, 0.0 }
  0x95   : > { %v774_v33 = vunpack.i.h.bf16 %v772_v28  ;;  %v773_v34 = vunpack.i.l.bf16 %v772_v28  ;;  %v764_v35 = vunpack.i.h.bf16 %v762_v29  ;;  %v763_v36 = vunpack.i.l.bf16 %v762_v29  ;;  %v370_v29 = vld [vmem:[%s1124_s1 + $0x8] sm:$0xff] }
  0x96   : > { %v344_v39 = vrot.slane %v294_v27, 4  ;;  %v345_v42 = vrot.slane %v295_v31, 4 }
  0x97   : > { %v278_v40 = vsel %vm274_vm4, 0.0, %v773_v34  ;;  %v275_v41 = vsel %vm274_vm4, %v773_v34, %v774_v33  ;;  %v267_v43 = vsel %vm266_vm5, %v763_v36, %v764_v35  ;;  %v269_v44 = vsel %vm266_vm5, 0.0, %v763_v36 }
  0x98   : > { %v777_v45 = vpop.permute.xlu0 %776  ;;  %v782_v46 = vpop.permute.xlu1 %781  ;;  %v284_v47 = vsel %vm993_vm8, %v275_v41, 0.0  ;;  %v283_v48 = vsel %vm999_vm9, %v278_v40, 0.0  ;;  %v338_v49 = vrot.slane %v269_v44, 4  ;;  %v339_v50 = vrot.slane %v267_v43, 4 }
  0x99   : > { %v779_v51 = vunpack.i.h.bf16 %v777_v45  ;;  %v778_v52 = vunpack.i.l.bf16 %v777_v45  ;;  %v784_v53 = vunpack.i.h.bf16 %v782_v46  ;;  %v783_v54 = vunpack.i.l.bf16 %v782_v46 }
  0x9a   : > { %v364_v55 = vsel %vm360_vm7, %v284_v47, %v345_v42  ;;  %v363_v56 = vsel %vm360_vm7, %v283_v48, %v344_v39  ;;  %v362_v59 = vsel %vm360_vm7, %v261_v37, %v339_v50  ;;  %v361_v60 = vsel %vm360_vm7, %v260_v38, %v338_v49 }
  0x9b   : > { %v301_v57 = vsel %vm300_vm6, %v779_v51, %v778_v52  ;;  %v304_v58 = vsel %vm300_vm6, %v778_v52, 0.0  ;;  %v323_v62 = vsel %vm322_vm10, %v784_v53, %v783_v54  ;;  %v325_v63 = vsel %vm322_vm10, %v783_v54, 0.0 }
  0x9c   : > { %v306_v61 = vsel %vm993_vm8, %v304_v58, 0.0  ;;  %v787_v2 = vpop.permute.xlu0 %786  ;;  %v691_v3 = vpack.c.bf16 %v364_v55, %v362_v59  ;;  %v356_v6 = vrot.slane %v323_v62, 4  ;;  %v357_v8 = vrot.slane %v325_v63, 4  ;;  %v329_v12 = vpop.permute.xlu1 %328 }
  0x9d   : > { %v352_v5 = vrot.slane %v306_v61, 4  ;;  %v789_v7 = vunpack.i.h.bf16 %v787_v2  ;;  %v788_v9 = vunpack.i.l.bf16 %v787_v2  ;;  %v305_v10 = vsel %vm999_vm9, %v301_v57, 0.0  ;;  %v560_v57 = vld [vmem:[%s212_s29] sm:$0xff] }
  0x9e   : > { %692 = vmatprep.subr.bf16.mxu0 %v691_v3  ;;  %699 = vmatprep.subr.bf16.mxu1 %v691_v3  ;;  %v693_v11 = vpack.c.bf16 %v363_v56, %v361_v60  ;;  %v351_v13 = vrot.slane %v305_v10, 4  ;;  %v334_v19 = vsel %vm330_vm12, %v329_v12, 0.0 }
  0x9f   : > { %v312_v14 = vsel %vm311_vm11, %v789_v7, %v788_v9  ;;  %v315_v15 = vsel %vm311_vm11, %v788_v9, 0.0  ;;  %v366_v22 = vsel %vm360_vm7, %v958_v1, %v352_v5  ;;  %v336_v18 = vsel %vm993_vm8, %v334_v19, 0.0 }
  0xa0   : > { %694 = vmatpush1.bf16.msra.mxu0 %v693_v11  ;;  %702 = vmatpush1.bf16.msra.mxu1 %v693_v11  ;;  %v317_v17 = vsel %vm985_vm3, %v315_v15, 0.0  ;;  %v327_v20 = vpop.permute.xlu0 %326  ;;  %v316_v21 = vsel %vm981_vm1, %v312_v14, 0.0  ;;  %v365_v24 = vsel %vm360_vm7, %v954_v0, %v351_v13  ;;  %v369_v0 = vld [vmem:[%s1124_s1] sm:$0xff] }
  0xa1   : > { %v368_v23 = vsel %vm360_vm7, %v317_v17, %v357_v8  ;;  %v367_v25 = vsel %vm360_vm7, %v316_v21, %v356_v6  ;;  %v331_v28 = vsel %vm330_vm12, %v327_v20, %v329_v12 }
  0xa2   : > { %v695_v26 = vpack.c.bf16 %v368_v23, %v366_v22  ;;  %v697_v27 = vpack.c.bf16 %v367_v25, %v365_v24  ;;  %v335_v1 = vsel %vm999_vm9, %v331_v28, 0.0 }
  0xa4   : > { %696 = vmatprep.subr.bf16.mxu0 %v695_v26  ;;  %700 = vmatprep.subr.bf16.mxu1 %v695_v26 }
  0xa5   : > { %698 = vmatpush1.bf16.msra.mxu0 %v697_v27  ;;  %703 = vmatpush1.bf16.msra.mxu1 %v697_v27 }
  0xa6   : > { %678 = vmatprep.subr.msk.mxu0 %vm360_vm7, %v336_v18  ;;  %701 = vmatprep.subr.msk.mxu1 %vm360_vm7, %v336_v18 }
  0xa9   : > { %679 = vmatpush1.msk.msra.mxu0 %vm360_vm7, %v335_v1  ;;  %704 = vmatpush1.msk.msra.mxu1 %vm360_vm7, %v335_v1 }
  0xaa   : > { %680 = vmatmul.mubr.msk.f32.vlgmr.msra.gmra.mrb[0].mxu0 %vm397_vm13, %v369_v0  ;;  %682 = vmatmul.mubr.msk.f32.vlgmr.msra.gmra.mrb[0].mxu1 %vm397_vm13, %v371_v16 }
  0xab   : > { %486 = vmatprep.mubr.f32.mxu0 %v867_v4  ;;  %498 = vmatprep.mubr.f32.mxu1 %v867_v4 }
  0xad   : > { %v380_v31 = vpop.permute.xlu1 %379 }
  0xae   : > { %681 = vmatmul.mubr.msk.f32.gmra.mrb[2].mxu0 %vm397_vm13, %v370_v29  ;;  %683 = vmatmul.mubr.msk.f32.gmra.mrb[2].mxu1 %vm397_vm13, %v372_v30 }
  0xb1   : > { %v385_v38 = vpop.permute.xlu0 %384  ;;  %v390_v44 = vpop.permute.xlu1 %389 }
  0xb5   : > { %v395_v51 = vpop.permute.xlu1 %394 }
 0x17d   : > { %v482_v32 = vpop.f32.mrb[0].mxu0  ;;  %v494_v33 = vpop.f32.mrb[0].mxu1 }
 0x17e   : > { %v483_v34 = vadd.f32 %v482_v32, %v380_v31  ;;  %v484_v35 = vpop.f32.mrb[1].mxu0  ;;  %v496_v36 = vpop.f32.mrb[1].mxu1  ;;  %v495_v47 = vadd.f32 %v494_v33, %v390_v44 }
 0x17f   : > { %v485_v37 = vadd.f32 %v484_v35, %v380_v31  ;;  %v497_v49 = vadd.f32 %v496_v36, %v390_v44 }
 0x181   : > { %v505_v39 = vadd.f32 %v485_v37, %v483_v34  ;;  %v488_v4 = vpop.f32.mrb[2].mxu0  ;;  %v500_v40 = vpop.f32.mrb[2].mxu1 }
 0x182   : > { %v489_v41 = vadd.f32 %v488_v4, %v385_v38  ;;  %v490_v42 = vpop.f32.mrb[3].mxu0  ;;  %v502_v43 = vpop.f32.mrb[3].mxu1  ;;  %v501_v52 = vadd.f32 %v500_v40, %v395_v51 }
 0x183   : > { %v491_v45 = vadd.f32 %v490_v42, %v385_v38  ;;  %v503_v54 = vadd.f32 %v502_v43, %v395_v51 }
 0x184   : > { %v506_v46 = vadd.f32 %v505_v39, %v489_v41 }
 0x186   : > { %v507_v48 = vadd.f32 %v506_v46, %v491_v45 }
 0x188   : > { %v508_v50 = vadd.f32 %v507_v48, %v495_v47 }
 0x18a   : > { %v509_v53 = vadd.f32 %v508_v50, %v497_v49 }
 0x18c   : > { %v510_v55 = vadd.f32 %v509_v53, %v501_v52 }
 0x18e   : > { %v511_v56 = vadd.f32 %v510_v55, %v503_v54 }
 0x190   : > { %512 = vadd.xlane.f32.xlu0 %v511_v56 }
 0x1a6   : > { %563 = vperm.xlu0 %791, %v560_v57  }
 0x21d   : > { %v513_v58 = vpop.xlane.xlu0 %512 }
 0x21e   : > { %v515_v59 = vmul.f32 0.0009765625, %v513_v58 }
 0x220   : > { %v516_v60 = vsub.f32 %v483_v34, %v515_v59  ;;  %v517_v61 = vsub.f32 %v485_v37, %v515_v59  ;;  %v518_v62 = vsub.f32 %v489_v41, %v515_v59  ;;  %v519_v63 = vsub.f32 %v491_v45, %v515_v59 }
 0x221   : > { %v520_v5 = vsub.f32 %v495_v47, %v515_v59  ;;  %v521_v8 = vsub.f32 %v497_v49, %v515_v59  ;;  %v522_v11 = vsub.f32 %v501_v52, %v515_v59  ;;  %v523_v14 = vsub.f32 %v503_v54, %v515_v59 }
 0x222   : > { %v524_v2 = vmul.f32 %v516_v60, %v516_v60  ;;  %v525_v3 = vmul.f32 %v517_v61, %v517_v61  ;;  %v526_v6 = vmul.f32 %v518_v62, %v518_v62  ;;  %v527_v9 = vmul.f32 %v519_v63, %v519_v63 }
 0x223   : > { %v528_v12 = vmul.f32 %v520_v5, %v520_v5  ;;  %v529_v15 = vmul.f32 %v521_v8, %v521_v8  ;;  %v530_v19 = vmul.f32 %v522_v11, %v522_v11  ;;  %v531_v21 = vmul.f32 %v523_v14, %v523_v14 }
 0x224   : > { %v532_v7 = vadd.f32 %v525_v3, %v524_v2 }
 0x225   : > { %v564_v36 = vpop.permute.xlu0 %563 }
 0x226   : > { %v533_v10 = vadd.f32 %v532_v7, %v526_v6 }
 0x228   : > { %v534_v13 = vadd.f32 %v533_v10, %v527_v9 }
 0x22a   : > { %v535_v17 = vadd.f32 %v534_v13, %v528_v12 }
 0x22c   : > { %v536_v20 = vadd.f32 %v535_v17, %v529_v15 }
 0x22e   : > { %v537_v22 = vadd.f32 %v536_v20, %v530_v19 }
 0x230   : > { %v538_v23 = vadd.f32 %v537_v22, %v531_v21 }
 0x232   : > { %539 = vadd.xlane.f32.xlu1 %v538_v23 }
 0x2bf   : > { %v540_v24 = vpop.xlane.xlu1 %539 }
 0x2c0   : > { %v541_v25 = vmul.f32 0.0009765625, %v540_v24 }
 0x2c2   : > { %v542_v26 = vadd.f32 1e-05, %v541_v25 }
 0x2c4   : > { %793 = vrsqrt.f32 %v542_v26 }
 0x2ce   : > { %v794_v27 = vpop.eup %793 }
 0x2cf   : > { %v544_v18 = vmul.f32 %v794_v27, %v516_v60  ;;  %v545_v28 = vmul.f32 %v794_v27, %v517_v61  ;;  %v546_v1 = vmul.f32 %v794_v27, %v518_v62  ;;  %v547_v0 = vmul.f32 %v794_v27, %v519_v63 }
 0x2d0   : > { %v548_v16 = vmul.f32 %v794_v27, %v520_v5  ;;  %v549_v29 = vmul.f32 %v794_v27, %v521_v8  ;;  %v550_v30 = vmul.f32 %v794_v27, %v522_v11  ;;  %v551_v31 = vmul.f32 %v794_v27, %v523_v14 }
 0x2d1   : > { %v552_v32 = vmax.f32 %v544_v18, 0.0  ;;  %v553_v33 = vmax.f32 %v545_v28, 0.0  ;;  %v554_v34 = vmax.f32 %v546_v1, 0.0  ;;  %v555_v35 = vmax.f32 %v547_v0, 0.0 }
 0x2d2   : > { %v556_v37 = vmax.f32 %v548_v16, 0.0  ;;  %v557_v38 = vmax.f32 %v549_v29, 0.0  ;;  %v558_v39 = vmax.f32 %v550_v30, 0.0  ;;  %v559_v4 = vmax.f32 %v551_v31, 0.0 }
 0x2d3   : > { %v566_v40 = vmul.f32 %v564_v36, %v552_v32  ;;  %v567_v41 = vmul.f32 %v564_v36, %v553_v33  ;;  %v568_v42 = vmul.f32 %v564_v36, %v554_v34  ;;  %v569_v43 = vmul.f32 %v564_v36, %v555_v35 }
 0x2d4   : > { %v570_v44 = vmul.f32 %v564_v36, %v556_v37  ;;  %v571_v45 = vmul.f32 %v564_v36, %v557_v38  ;;  %v572_v46 = vmul.f32 %v564_v36, %v558_v39  ;;  %v573_v47 = vmul.f32 %v564_v36, %v559_v4 }
 0x2d5   : > { %574 = vst [vmem:[%s203_s5] sm:$0xff] %v566_v40  ;;  %575 = vst [vmem:[%s203_s5 + $0x8] sm:$0xff] %v567_v41 }
 0x2d6   : > { %576 = vst [vmem:[%s203_s5 + $0x10] sm:$0xff] %v568_v42  ;;  %577 = vst [vmem:[%s203_s5 + $0x18] sm:$0xff] %v569_v43 }
 0x2d7   : > { %578 = vst [vmem:[%s203_s5 + $0x20] sm:$0xff] %v570_v44  ;;  %579 = vst [vmem:[%s203_s5 + $0x28] sm:$0xff] %v571_v45 }
 0x2d8   : > { %580 = vst [vmem:[%s203_s5 + $0x30] sm:$0xff] %v572_v46  ;;  %581 = vst [vmem:[%s203_s5 + $0x38] sm:$0xff] %v573_v47 }
 0x2d9   : > { %808 = shalt.err (!%p805_p3)
}
 0x2da   : > { %s809_s20 = scalar_lea.hbm %s1075_s19, 1024  ;;  %s813_s29 = scalar_lea.hbm %s1127_s4, 2048 }
 0x2db   : > { %p810_p4 = scmp.ne.s32.totalorder %s1075_s19, %s809_s20  ;;  %p814_p9 = scmp.lt.u32.totalorder %s1075_s19, %s1127_s4 }
 0x2dc   : > { %p815_p10 = scmp.lt.u32.totalorder %s813_s29, %s809_s20  ;;  %p817_p12 = scmp.lt.u32.totalorder %s809_s20, %s1075_s19 }
 0x2dd   : > { %p811_p7 = pnand %p810_p4, %p934_p5 }
 0x2de   : > { %p816_p11 = por %p815_p10, %p814_p9 }
 0x2df   : > { %p812_p8 = pneg %p811_p7 }
 0x2e0   : > { %p818_p13 = por %p817_p12, %p816_p11 }
 0x2e2   : > { %p819_p0 = pnand %p818_p13, %p812_p8 }
 0x2e4   : > { %822 = shalt.err (!%p819_p0)
}
 0x2e5   : > { %s870_s30 = smov 256  }
 0x2e6   : > { %705 = dma.vmem_to_hbm [thread:$0]  (%p934_p5), %s1077_s6, 1024, %s1075_s19, %s1081_s10, %s870_s30, %s870_s30, %s862_s9  }
 0x2e7 PF: > { %p711_p1 = scmp.ge.s32.totalorder %s857_s18, 2  ;;  %s611_s5 = sand.u32 1, %s845_s15  }
 0x2e8   : > { %s612_s7 = scalar_lea.sflag [#allocation3], %s611_s5 }
 0x2e9   : > { %p708_p2 = pnand %p711_p1, %p938_p6 }
 0x2eb   : > { %840 = dma.done.wait (!%p708_p2), %s612_s7, 1024  }
 0x2ec   : > { %842 = vsyncadd (!%p708_p2), %s612_s7, 4294966272  ;;  %p14_p3 = scmp.ge.s32.totalorder %s921_s21, 4   ;;  %s1138_s15 = smov %s849_s16 }
 0x2ed   : > { %s1139_s16 = smov %s853_s17  ;;  %s1140_s17 = smov %s932_s24 }
 0x2ee   : > { %s1141_s18 = smov %s921_s21  ;;  %16 = sbr.rel (!%p14_p3) target bundleno = 3 (0x3), region = 74 }
 0x2f5   :  { %617 = vsyncpa [#allocation3], 1 }
 0x2f6   :  { %619 = vsyncpa [#allocation3 + $0x1], 1 }

</bundles_post_ra>
